<compile_context>
chip_gen: v5e
topology: v5e:2x2
jax: 0.10.0
libtpu: 0.0.40
codegen_flags: <defaults>
</compile_context>

<pallas_src>
import functools

import jax
import jax.numpy as jnp
from jax.experimental import pallas as pl
from jax.experimental.pallas import tpu as pltpu

LANES = 128
SUBLANES = 8
# (1024, 128) f32 tile = 512 KiB per stream; 2 streams x 2 pipeline buffers = 2 MiB VMEM.
# Comfortably under the scoped-VMEM defaults on v5e (16 MiB), v6e (32 MiB), v7x (32 MiB).
MAX_TILE_ROWS = 1024


def _bce_sum_kernel(p_ref, t_ref, o_ref, acc_ref, *, n_valid, tile_rows):
    i = pl.program_id(0)

    @pl.when(i == 0)
    def _():
        acc_ref[...] = jnp.zeros_like(acc_ref)

    # Cast on the loaded tile (VPU cast is free filler under the DMA).
    p = p_ref[...].astype(jnp.float32)
    t = t_ref[...].astype(jnp.float32)

    # In-kernel mask for the ragged / padded tail: global element index vs. the
    # true element count (static, closed over). Sanitize p before the log so
    # garbage in the out-of-bounds region can never produce NaN/Inf.
    row_ids = jax.lax.broadcasted_iota(jnp.int32, (tile_rows, LANES), 0)
    lane_ids = jax.lax.broadcasted_iota(jnp.int32, (tile_rows, LANES), 1)
    gidx = (i * tile_rows + row_ids) * LANES + lane_ids
    valid = gidx < n_valid

    p = jnp.where(valid, p, 0.5)
    t = jnp.where(valid, t, 0.0)

    # PyTorch BCELoss clamps each log term at -100.
    log_p = jnp.maximum(jnp.log(p), -100.0)
    log_1mp = jnp.maximum(jnp.log(1.0 - p), -100.0)
    elem = jnp.where(valid, -(t * log_p + (1.0 - t) * log_1mp), 0.0)

    # vreg-shaped running sum: fold 8-row groups with VPU adds (no per-tile
    # cross-lane reduce, no serial scalar dependency chain).
    acc_ref[...] += jnp.sum(
        elem.reshape(tile_rows // SUBLANES, SUBLANES, LANES), axis=0
    )

    @pl.when(i == pl.num_programs(0) - 1)
    def _():
        # Single cross-lane/sublane reduce, once per kernel.
        o_ref[...] = jnp.sum(acc_ref[...], keepdims=True)


@jax.jit
def gan_loss(prediction, target):
    """BCELoss(prediction, target) with mean reduction, computed in Pallas."""
    assert prediction.shape == target.shape
    n = prediction.size  # static

    p_flat = prediction.reshape(-1)
    t_flat = target.reshape(-1)

    # Minimal padding: only up to the (8, 128) slab boundary (< 1024 elements),
    # and only when actually needed. Padded tail is masked inside the kernel.
    slab = SUBLANES * LANES
    n_pad = ((n + slab - 1) // slab) * slab
    if n_pad != n:
        p_flat = jnp.pad(p_flat, (0, n_pad - n))
        t_flat = jnp.pad(t_flat, (0, n_pad - n))

    rows = n_pad // LANES  # multiple of 8
    tile_rows = min(MAX_TILE_ROWS, rows)  # multiple of 8
    grid = (pl.cdiv(rows, tile_rows),)  # ragged last tile handled in-kernel

    p2 = p_flat.reshape(rows, LANES)
    t2 = t_flat.reshape(rows, LANES)

    tile_spec = pl.BlockSpec((tile_rows, LANES), lambda i: (i, 0))
    kernel = functools.partial(_bce_sum_kernel, n_valid=n, tile_rows=tile_rows)

    total = pl.pallas_call(
        kernel,
        out_shape=jax.ShapeDtypeStruct((1, 1), jnp.float32),
        grid_spec=pltpu.PrefetchScalarGridSpec(
            num_scalar_prefetch=0,
            grid=grid,
            in_specs=[tile_spec, tile_spec],
            out_specs=pl.BlockSpec((1, 1), lambda i: (0, 0)),
            scratch_shapes=[pltpu.VMEM((SUBLANES, LANES), jnp.float32)],
        ),
        compiler_params=pltpu.CompilerParams(
            dimension_semantics=("arbitrary",)
        ),
    )(p2, t2)

    return (total[0, 0] / jnp.float32(n)).astype(jnp.float32)


def _reference_bce(prediction, target):
    p = prediction.astype(jnp.float32)
    t = target.astype(jnp.float32)
    log_p = jnp.maximum(jnp.log(p), -100.0)
    log_1mp = jnp.maximum(jnp.log(1.0 - p), -100.0)
    return jnp.mean(-(t * log_p + (1.0 - t) * log_1mp))


if __name__ == "__main__":
    key = jax.random.PRNGKey(0)
    k1, k2 = jax.random.split(key)

    # Discriminator-output-like tensors: NCHW [2, 4, 16, 16], values in (0, 1).
    prediction = jax.nn.sigmoid(jax.random.normal(k1, (2, 4, 16, 16), jnp.float32))
    # Mix of "real" (1) and "fake" (0) targets.
    target = (jax.random.uniform(k2, (2, 4, 16, 16)) > 0.5).astype(jnp.float32)

    loss = gan_loss(prediction, target)
    jax.block_until_ready(loss)

    ref = _reference_bce(prediction, target)
    assert jnp.allclose(loss, ref, rtol=1e-5, atol=1e-5), (loss, ref)

    # Non-128-divisible size exercises the in-kernel tail masking path.
    k3, k4 = jax.random.split(k1)
    p_odd = jax.nn.sigmoid(jax.random.normal(k3, (3, 5, 7), jnp.float32))
    t_odd = jax.random.uniform(k4, (3, 5, 7), jnp.float32)  # soft labels
    loss_odd = gan_loss(p_odd, t_odd)
    jax.block_until_ready(loss_odd)
    assert jnp.allclose(loss_odd, _reference_bce(p_odd, t_odd), rtol=1e-5, atol=1e-5)

    print("KERNEL_OK")
</pallas_src>

<mosaic_0001>
module attributes {stable_mosaic.version = 11 : i64} {
  func.func @_bce_sum_kernel(%arg0: i32, %arg1: memref<16x128xf32, #tpu.memory_space<vmem>>, %arg2: memref<16x128xf32, #tpu.memory_space<vmem>>, %arg3: memref<1x1xf32, #tpu.memory_space<vmem>>, %arg4: memref<8x128xf32, #tpu.memory_space<vmem>>) attributes {dimension_semantics = [#tpu.dimension_semantics<arbitrary>], iteration_bounds = array<i64: 1>, scalar_prefetch = 0 : i64, scratch_operands = 1 : i64, tpu.core_type = #tpu.core_type<tc>, window_params = [{transform_indices = @transform_0, window_bounds = array<i64: 16, 128>}, {transform_indices = @transform_1, window_bounds = array<i64: 16, 128>}, {pipeline_mode = #tpu.pipeline_mode<synchronous>, transform_indices = @transform_2, window_bounds = array<i64: 1, 1>}]} {
    %c0_i32 = arith.constant 0 : i32
    %0 = arith.cmpi eq, %arg0, %c0_i32 : i32
    %1 = arith.extui %0 : i1 to i32
    %c0_i32_0 = arith.constant 0 : i32
    %2 = arith.cmpi ne, %1, %c0_i32_0 : i32
    scf.if %2 {
      %cst_18 = arith.constant 0.000000e+00 : f32
      %44 = vector.broadcast %cst_18 : f32 to vector<8x128xf32>
      %c0_19 = arith.constant 0 : index
      %c0_20 = arith.constant 0 : index
      %45 = vector.load %arg4[%c0_19, %c0_20] : memref<8x128xf32, #tpu.memory_space<vmem>>, vector<8x128xf32>
      tpu.vector_store %arg4[%c0_19, %c0_20], %44 {strides = array<i32>} : memref<8x128xf32, #tpu.memory_space<vmem>>, vector<8x128xf32>,
    } else {
    }
    %c0 = arith.constant 0 : index
    %c0_1 = arith.constant 0 : index
    %3 = vector.load %arg1[%c0, %c0_1] : memref<16x128xf32, #tpu.memory_space<vmem>>, vector<16x128xf32>
    %c0_2 = arith.constant 0 : index
    %c0_3 = arith.constant 0 : index
    %4 = vector.load %arg2[%c0_2, %c0_3] : memref<16x128xf32, #tpu.memory_space<vmem>>, vector<16x128xf32>
    %5 = tpu.iota {dimensions = array<i32: 0>} : vector<16x128xi32>
    %6 = tpu.iota {dimensions = array<i32: 1>} : vector<16x128xi32>
    %c16_i32 = arith.constant 16 : i32
    %7 = arith.muli %arg0, %c16_i32 : i32
    %8 = vector.broadcast %7 : i32 to vector<16x128xi32>
    %9 = arith.addi %8, %5 : vector<16x128xi32>
    %c128_i32 = arith.constant 128 : i32
    %10 = vector.broadcast %c128_i32 : i32 to vector<16x128xi32>
    %11 = arith.muli %9, %10 : vector<16x128xi32>
    %12 = arith.addi %11, %6 : vector<16x128xi32>
    %c2048_i32 = arith.constant 2048 : i32
    %13 = vector.broadcast %c2048_i32 : i32 to vector<16x128xi32>
    %14 = arith.cmpi slt, %12, %13 : vector<16x128xi32>
    %cst = arith.constant 5.000000e-01 : f32
    %15 = vector.broadcast %cst : f32 to vector<16x128xf32>
    %16 = arith.select %14, %3, %15 : vector<16x128xi1>, vector<16x128xf32>
    %cst_4 = arith.constant 0.000000e+00 : f32
    %17 = vector.broadcast %cst_4 : f32 to vector<16x128xf32>
    %18 = arith.select %14, %4, %17 : vector<16x128xi1>, vector<16x128xf32>
    %19 = math.log %16 : vector<16x128xf32>
    %cst_5 = arith.constant -1.000000e+02 : f32
    %20 = vector.broadcast %cst_5 : f32 to vector<16x128xf32>
    %21 = arith.maximumf %19, %20 : vector<16x128xf32>
    %cst_6 = arith.constant 1.000000e+00 : f32
    %22 = vector.broadcast %cst_6 : f32 to vector<16x128xf32>
    %23 = arith.subf %22, %16 : vector<16x128xf32>
    %24 = math.log %23 : vector<16x128xf32>
    %cst_7 = arith.constant -1.000000e+02 : f32
    %25 = vector.broadcast %cst_7 : f32 to vector<16x128xf32>
    %26 = arith.maximumf %24, %25 : vector<16x128xf32>
    %27 = arith.mulf %18, %21 : vector<16x128xf32>
    %cst_8 = arith.constant 1.000000e+00 : f32
    %28 = vector.broadcast %cst_8 : f32 to vector<16x128xf32>
    %29 = arith.subf %28, %18 : vector<16x128xf32>
    %30 = arith.mulf %29, %26 : vector<16x128xf32>
    %31 = arith.addf %27, %30 : vector<16x128xf32>
    %cst_9 = arith.constant 0.000000e+00 : f32
    %32 = vector.broadcast %cst_9 : f32 to vector<16x128xf32>
    %33 = arith.subf %32, %31 : vector<16x128xf32>
    %cst_10 = arith.constant 0.000000e+00 : f32
    %34 = vector.broadcast %cst_10 : f32 to vector<16x128xf32>
    %35 = arith.select %14, %33, %34 : vector<16x128xi1>, vector<16x128xf32>
    %c0_11 = arith.constant 0 : index
    %c0_12 = arith.constant 0 : index
    %36 = vector.load %arg4[%c0_11, %c0_12] : memref<8x128xf32, #tpu.memory_space<vmem>>, vector<8x128xf32>
    %37 = vector.shape_cast %35 : vector<16x128xf32> to vector<2x8x128xf32>
    %cst_13 = arith.constant dense<0.000000e+00> : vector<8x128xf32>
    %38 = vector.multi_reduction <add>, %37, %cst_13 [0] : vector<2x8x128xf32> to vector<8x128xf32>
    %39 = arith.addf %36, %38 : vector<8x128xf32>
    %c0_14 = arith.constant 0 : index
    %c0_15 = arith.constant 0 : index
    %40 = vector.load %arg4[%c0_14, %c0_15] : memref<8x128xf32, #tpu.memory_space<vmem>>, vector<8x128xf32>
    tpu.vector_store %arg4[%c0_14, %c0_15], %39 {strides = array<i32>} : memref<8x128xf32, #tpu.memory_space<vmem>>, vector<8x128xf32>,
    %c0_i32_16 = arith.constant 0 : i32
    %41 = arith.cmpi eq, %arg0, %c0_i32_16 : i32
    %42 = arith.extui %41 : i1 to i32
    %c0_i32_17 = arith.constant 0 : i32
    %43 = arith.cmpi ne, %42, %c0_i32_17 : i32
    scf.if %43 {
      %c0_18 = arith.constant 0 : index
      %c0_19 = arith.constant 0 : index
      %44 = vector.load %arg4[%c0_18, %c0_19] : memref<8x128xf32, #tpu.memory_space<vmem>>, vector<8x128xf32>
      %45 = vector.shape_cast %44 : vector<8x128xf32> to vector<1x8x128xf32>
      %cst_20 = arith.constant dense<0.000000e+00> : vector<1xf32>
      %46 = vector.multi_reduction <add>, %45, %cst_20 [1, 2] : vector<1x8x128xf32> to vector<1xf32>
      %47 = vector.shape_cast %46 : vector<1xf32> to vector<1x1x1xf32>
      %48 = vector.extract %47[0, 0, 0] : f32 from vector<1x1x1xf32>
      %49 = vector.broadcast %48 : f32 to vector<1x1xf32>
      %c0_21 = arith.constant 0 : index
      %c0_22 = arith.constant 0 : index
      %50 = vector.load %arg3[%c0_21, %c0_22] : memref<1x1xf32, #tpu.memory_space<vmem>>, vector<1x1xf32>
      tpu.vector_store %arg3[%c0_21, %c0_22], %49 {strides = array<i32>} : memref<1x1xf32, #tpu.memory_space<vmem>>, vector<1x1xf32>,
    } else {
    }
    return
  }
  func.func @transform_0(%arg0: i32) -> (i32, i32) {
    %c0_i32 = arith.constant 0 : i32
    %c0_i32_0 = arith.constant 0 : i32
    return %arg0, %c0_i32 : i32, i32
  }
  func.func @transform_1(%arg0: i32) -> (i32, i32) {
    %c0_i32 = arith.constant 0 : i32
    %c0_i32_0 = arith.constant 0 : i32
    return %arg0, %c0_i32 : i32, i32
  }
  func.func @transform_2(%arg0: i32) -> (i32, i32) {
    %c0_i32 = arith.constant 0 : i32
    %c0_i32_0 = arith.constant 0 : i32
    %c0_i32_1 = arith.constant 0 : i32
    return %c0_i32, %c0_i32_0 : i32, i32
  }
}

</mosaic_0001>

<bundles_post_ra>
// kernel: gan_loss.1
= control target key start
LH: loop header
LB: loop body
LE: loop exit
PB: predicated region body
PF: predicated region fallthrough
CT: control target
= control target key end

     0   :  { %v21_v0 = vlaneseq  ;;  %s176_s0 = inlined_call_operand.vmem [shape: f32[16,128], index: 0, kind: input, shape index: {}]   ;;  %s177_s1 = inlined_call_operand.vmem [shape: f32[16,128], index: 1, kind: input, shape index: {}]   ;;  %s178_s2 = inlined_call_operand.hbm [shape: f32[1,1], index: 2, kind: output, shape index: {}]  }
   0x1   :  { %7 = vsyncpa [#allocation4], 0  ;;  %v17_v5 = vld [vmem:[%s176_s0] sm:$0xff]  ;;  %v18_v8 = vld [vmem:[%s176_s0 + $0x8] sm:$0xff]  ;;  %s139_s0 = smov [#allocation3]   ;;  %s93_s19 = sshll.u32 %s178_s2, 4  ;;  %s94_s19 = int_to_ptr.hbm [resolvable:$true] %s93_s19 }
   0x2   :  { %v22_v1 = vshrl.u32 %v21_v0, 7  ;;  %v25_v2 = vand.u32 127, %v21_v0  ;;  %v19_v14 = vld [vmem:[%s177_s1] sm:$0xff]  ;;  %v20_v15 = vld [vmem:[%s177_s1 + $0x8] sm:$0xff]  ;;  %s91_s1 = sshll.u32 %s139_s0, 4  ;;  %vm84_vm2 = vcmask 0   ;;  %s92_s1 = int_to_ptr.vmem [resolvable:$true] %s91_s1 }
   0x4   :  { %v23_v3 = vadd.s32 8, %v22_v1  ;;  %v30_v4 = vmul.u32 128, %v22_v1 }
   0x6   :  { %v31_v6 = vmul.u32 128, %v23_v3  ;;  %v32_v7 = vadd.s32 %v30_v4, %v25_v2 }
   0x8   :  { %v33_v9 = vadd.s32 %v31_v6, %v25_v2  ;;  %vm34_vm0 = vcmp.lt.s32.totalorder %v32_v7, 2048 }
   0x9   :  { %v36_v10 = vsel %vm34_vm0, %v17_v5, 0.5  ;;  %v38_v17 = vsel %vm34_vm0, %v19_v14, 0.0 }
   0xa   :  { %vm35_vm1 = vcmp.lt.s32.totalorder %v33_v9, 2048  ;;  %105 = vlog2.f32 %v36_v10  ;;  %v46_v11 = vsub.f32 1.0, %v36_v10  ;;  %v56_v26 = vsub.f32 1.0, %v38_v17 }
   0xb   :  { %v37_v12 = vsel %vm35_vm1, %v18_v8, 0.5  ;;  %v39_v20 = vsel %vm35_vm1, %v20_v15, 0.0 }
   0xc   :  { %107 = vlog2.f32 %v37_v12  ;;  %v47_v13 = vsub.f32 1.0, %v37_v12  ;;  %v57_v29 = vsub.f32 1.0, %v39_v20 }
   0xd   :  { %109 = vlog2.f32 %v46_v11 }
   0xe   :  { %111 = vlog2.f32 %v47_v13 }
  0x10   :  { %v106_v16 = vpop.eup %105 }
  0x11   :  { %v41_v18 = vmul.f32 0.6931472, %v106_v16 }
  0x12   :  { %v108_v19 = vpop.eup %107 }
  0x13   :  { %v110_v21 = vpop.eup %109  ;;  %v43_v22 = vmul.f32 0.6931472, %v108_v19  ;;  %v44_v23 = vmax.f32 %v41_v18, -100.0 }
  0x14   :  { %v112_v24 = vpop.eup %111  ;;  %v49_v25 = vmul.f32 0.6931472, %v110_v21 }
  0x15   :  { %v45_v27 = vmax.f32 %v43_v22, -100.0  ;;  %v51_v28 = vmul.f32 0.6931472, %v112_v24  ;;  %v54_v31 = vmul.f32 %v44_v23, %v38_v17 }
  0x16   :  { %v52_v30 = vmax.f32 %v49_v25, -100.0 }
  0x17   :  { %v53_v32 = vmax.f32 %v51_v28, -100.0  ;;  %v55_v33 = vmul.f32 %v45_v27, %v39_v20 }
  0x18   :  { %v58_v34 = vmul.f32 %v56_v26, %v52_v30 }
  0x19   :  { %v59_v35 = vmul.f32 %v57_v29, %v53_v32 }
  0x1a   :  { %v60_v36 = vadd.f32 %v58_v34, %v54_v31 }
  0x1b   :  { %v61_v37 = vadd.f32 %v59_v35, %v55_v33 }
  0x1c   :  { %v62_v38 = vsub.f32 0.0, %v60_v36 }
  0x1d   :  { %v63_v39 = vsub.f32 0.0, %v61_v37 }
  0x1e   :  { %v64_v40 = vsel %vm34_vm0, %v62_v38, 0.0 }
  0x1f   :  { %v65_v41 = vsel %vm35_vm1, %v63_v39, 0.0 }
  0x20   :  { %v67_v42 = vadd.f32 %v65_v41, %v64_v40 }
  0x22   :  { %74 = vadd.xlane.f32.xlu0 %v67_v42 }
  0x95   :  { %v75_v43 = vpop.xlane.xlu0 %74 }
  0x96   :  { %v76_v44 = vrot.slane %v75_v43, 4 }
  0x98   :  { %v77_v45 = vadd.f32 %v76_v44, %v75_v43 }
  0x9a   :  { %v78_v46 = vrot.slane %v77_v45, 2 }
  0x9c   :  { %v79_v47 = vadd.f32 %v78_v46, %v77_v45 }
  0x9e   :  { %v80_v48 = vrot.slane %v79_v47, 1 }
  0xa0   :  { %v81_v49 = vadd.f32 %v80_v48, %v79_v47 }
  0xa2   :  { %102 = vpush %v81_v49 }
  0xd3   :  { %s103_s20 = spop %102 }
  0xd4   :  { %v83_v50 = vstv %s103_s20 }
  0xd5   :  { %85 = vst.msk [vmem:[#allocation3] sm:$0x1] %vm84_vm2, %v83_v50 }
  0xd6   :  { %96 = dma.vmem_to_hbm [thread:$0]  %s92_s1, 16, %s94_s19, [#allocation4]  }
  0xd7   :  { %137 = dma.done.wait [#allocation4], 16  }
  0xd8   :  { %138 = vsyncadd [#allocation4], 4294967280 }
  0xd9   :  { %101 = vsyncpa [#allocation4], 1 }

</bundles_post_ra>
